<compile_context>
chip_gen: v7x
topology: tpu7x:2x2x1
jax: 0.10.0
libtpu: 0.0.40
codegen_flags: <defaults>
</compile_context>

<pallas_src>
import jax
import jax.numpy as jnp
from jax.experimental import pallas as pl
from jax.experimental.pallas import tpu as pltpu


_PAD_NEG = -1e9  # BCE(x=-1e9, y=0) == 0 exactly in f32 -> padded rows are free.


def _round_up(x, m):
    return (x + m - 1) // m * m


def _bce2way_kernel(logit_ref, target_ref, frame_ref, loss_ref, aux_ref, max_sc):
    t = pl.program_id(1)
    nt = pl.num_programs(1)

    # Per-tile time reduction (XLU sublane reduce) in the input dtype, combined
    # into the running max with an elementwise maximum (max is exact in bf16).
    tile_max = jnp.max(frame_ref[...], axis=1)          # (block_b, C)

    @pl.when(t == 0)
    def _():
        max_sc[...] = tile_max

    @pl.when(t != 0)
    def _():
        max_sc[...] = jnp.maximum(max_sc[...], tile_max)

    @pl.when(t == nt - 1)
    def _():
        y = target_ref[...].astype(jnp.float32)          # target.float()
        x = logit_ref[...].astype(jnp.float32)
        m = max_sc[...].astype(jnp.float32)              # upcast only the reduced tile

        def bce_sum(z):
            # Numerically stable BCE-with-logits, per-element SUM:
            #   max(z, 0) - z*y + log(1 + exp(-|z|))
            per_elem = (jnp.maximum(z, 0.0) - z * y
                        + jnp.log1p(jnp.exp(-jnp.abs(z))))
            return jnp.sum(per_elem)

        # Tiny per-B-block partial sums, broadcast into a lane-dense (1,8,128)
        # block (unmasked vst); wrapper reads element [i, 0, 0].
        loss_ref[...] = jnp.broadcast_to(bce_sum(x), loss_ref.shape).astype(jnp.float32)
        aux_ref[...] = jnp.broadcast_to(bce_sum(m), aux_ref.shape).astype(jnp.float32)


def bce_2way_loss(logit, frame_logit, target, weights=(1.0, 1.0),
                  block_b=None, block_t=None, vmem_limit_bytes=None):
    """Pallas implementation of BCE2WayLoss.forward. Returns a scalar f32."""
    B, C = logit.shape
    _, T, _ = frame_logit.shape
    itemsize = jnp.dtype(frame_logit.dtype).itemsize

    # ---- tile selection -----------------------------------------------------
    # B tile: full B when small, else a multiple of 8 (sublane constraint on the
    # resident (block_b, C) logit/target blocks).
    if block_b is None:
        block_b = B if B <= 8 else 8
    if block_b >= B:
        block_b = B
        b_pad = B
    else:
        block_b = max(8, (block_b // 8) * 8)
        b_pad = _round_up(B, block_b)

    # T tile: aim for ~2 MiB frame blocks (x2 double-buffered this stays well
    # inside the 16/32/32 MiB default scoped VMEM on v5e/v6e/v7x). Raise
    # vmem_limit_bytes and block_t for bigger tiles on v6e (128 MiB physical).
    if block_t is None:
        row_bytes = max(1, block_b * C * itemsize)
        block_t = max(8, ((2 * 1024 * 1024) // row_bytes) // 8 * 8)
    if block_t >= T:
        block_t = T
        t_pad = T
    else:
        block_t = max(8, (block_t // 8) * 8)
        t_pad = _round_up(T, block_t)

    nb = b_pad // block_b
    nt = t_pad // block_t

    # ---- padding (contributes exactly zero to the BCE sums) ------------------
    if t_pad != T or b_pad != B:
        frame_logit = jnp.pad(frame_logit,
                              ((0, b_pad - B), (0, t_pad - T), (0, 0)),
                              constant_values=_PAD_NEG)
    if b_pad != B:
        logit = jnp.pad(logit, ((0, b_pad - B), (0, 0)), constant_values=_PAD_NEG)
        target = jnp.pad(target, ((0, b_pad - B), (0, 0)), constant_values=0.0)

    # ---- kernel call ----------------------------------------------------------
    loss_parts, aux_parts = pl.pallas_call(
        _bce2way_kernel,
        out_shape=(jax.ShapeDtypeStruct((nb, 8, 128), jnp.float32),
                   jax.ShapeDtypeStruct((nb, 8, 128), jnp.float32)),
        grid_spec=pltpu.PrefetchScalarGridSpec(
            num_scalar_prefetch=0,
            grid=(nb, nt),
            in_specs=[
                pl.BlockSpec((block_b, C), lambda i, t: (i, 0)),           # logit (resident)
                pl.BlockSpec((block_b, C), lambda i, t: (i, 0)),           # target (resident)
                pl.BlockSpec((block_b, block_t, C), lambda i, t: (i, t, 0)),  # frame (streamed)
            ],
            out_specs=[
                pl.BlockSpec((1, 8, 128), lambda i, t: (i, 0, 0)),
                pl.BlockSpec((1, 8, 128), lambda i, t: (i, 0, 0)),
            ],
            scratch_shapes=[pltpu.VMEM((block_b, C), frame_logit.dtype)],
        ),
        compiler_params=pltpu.CompilerParams(
            dimension_semantics=("parallel", "arbitrary"),
            vmem_limit_bytes=vmem_limit_bytes,
        ),
    )(logit, target, frame_logit)

    # Finalize in the wrapper: sum per-block partials, divide by the TRUE
    # (unpadded) element count, apply the loss weights.
    inv_n = jnp.float32(1.0 / (B * C))
    loss = loss_parts[:, 0, 0].sum() * inv_n
    aux_loss = aux_parts[:, 0, 0].sum() * inv_n
    return jnp.float32(weights[0]) * loss + jnp.float32(weights[1]) * aux_loss


def _reference(logit, frame_logit, target, weights=(1.0, 1.0)):
    # Pure-JAX reference for correctness checks.
    t = target.astype(jnp.float32)

    def bce(x, y):
        x = x.astype(jnp.float32)
        return jnp.mean(jnp.maximum(x, 0.0) - x * y + jnp.log1p(jnp.exp(-jnp.abs(x))))

    clip_max = jnp.max(frame_logit.astype(jnp.float32), axis=1)
    return weights[0] * bce(logit, t) + weights[1] * bce(clip_max, t)


if __name__ == "__main__":
    B, T, C = 12, 20, 160  # batch, time frames, classes (C not a multiple of 128)

    key = jax.random.PRNGKey(0)
    k1, k2, k3 = jax.random.split(key, 3)
    logit = jax.random.normal(k1, (B, C), dtype=jnp.float32)
    frame_logit = jax.random.normal(k2, (B, T, C), dtype=jnp.float32)
    target = (jax.random.uniform(k3, (B, C)) > 0.5).astype(jnp.float32)

    ref = _reference(logit, frame_logit, target, weights=(1.0, 0.5))

    # 1) Small explicit tiles: exercises B padding, T padding, resident blocks
    #    and the running-max accumulator across a (2, 3) grid.
    out_tiled = bce_2way_loss(logit, frame_logit, target, weights=(1.0, 0.5),
                              block_b=8, block_t=8)
    out_tiled = jax.block_until_ready(out_tiled)
    assert jnp.allclose(out_tiled, ref, rtol=1e-5, atol=1e-5), (out_tiled, ref)

    # 2) Automatic tile selection (single T step at this small size).
    out_auto = bce_2way_loss(logit, frame_logit, target, weights=(1.0, 0.5))
    out_auto = jax.block_until_ready(out_auto)
    assert jnp.allclose(out_auto, ref, rtol=1e-5, atol=1e-5), (out_auto, ref)

    print("KERNEL_OK")
</pallas_src>

<mosaic_0001>
module attributes {stable_mosaic.version = 11 : i64} {
  func.func @_bce2way_kernel(%arg0: i32, %arg1: i32, %arg2: memref<8x160xf32, #tpu.memory_space<vmem>>, %arg3: memref<8x160xf32, #tpu.memory_space<vmem>>, %arg4: memref<8x8x160xf32, #tpu.memory_space<vmem>>, %arg5: memref<1x8x128xf32, #tpu.memory_space<vmem>>, %arg6: memref<1x8x128xf32, #tpu.memory_space<vmem>>, %arg7: memref<8x160xf32, #tpu.memory_space<vmem>>) attributes {dimension_semantics = [#tpu.dimension_semantics<parallel>, #tpu.dimension_semantics<arbitrary>], iteration_bounds = array<i64: 2, 3>, scalar_prefetch = 0 : i64, scratch_operands = 1 : i64, tpu.core_type = #tpu.core_type<tc>, window_params = [{transform_indices = @transform_0, window_bounds = array<i64: 8, 160>}, {transform_indices = @transform_1, window_bounds = array<i64: 8, 160>}, {transform_indices = @transform_2, window_bounds = array<i64: 8, 8, 160>}, {transform_indices = @transform_3, window_bounds = array<i64: 1, 8, 128>}, {transform_indices = @transform_4, window_bounds = array<i64: 1, 8, 128>}]} {
    %c0 = arith.constant 0 : index
    %c0_0 = arith.constant 0 : index
    %c0_1 = arith.constant 0 : index
    %0 = vector.load %arg4[%c0, %c0_0, %c0_1] : memref<8x8x160xf32, #tpu.memory_space<vmem>>, vector<8x8x160xf32>
    %cst = arith.constant dense<0xFF800000> : vector<8x160xf32>
    %1 = vector.multi_reduction <maximumf>, %0, %cst [1] : vector<8x8x160xf32> to vector<8x160xf32>
    %c0_i32 = arith.constant 0 : i32
    %2 = arith.cmpi eq, %arg1, %c0_i32 : i32
    %3 = arith.extui %2 : i1 to i32
    %c0_i32_2 = arith.constant 0 : i32
    %4 = arith.cmpi ne, %3, %c0_i32_2 : i32
    scf.if %4 {
      %c0_6 = arith.constant 0 : index
      %c0_7 = arith.constant 0 : index
      %11 = vector.load %arg7[%c0_6, %c0_7] : memref<8x160xf32, #tpu.memory_space<vmem>>, vector<8x160xf32>
      tpu.vector_store %arg7[%c0_6, %c0_7], %1 {strides = array<i32>} : memref<8x160xf32, #tpu.memory_space<vmem>>, vector<8x160xf32>,
    } else {
    }
    %c0_i32_3 = arith.constant 0 : i32
    %5 = arith.cmpi ne, %arg1, %c0_i32_3 : i32
    %6 = arith.extui %5 : i1 to i32
    %c0_i32_4 = arith.constant 0 : i32
    %7 = arith.cmpi ne, %6, %c0_i32_4 : i32
    scf.if %7 {
      %c0_6 = arith.constant 0 : index
      %c0_7 = arith.constant 0 : index
      %11 = vector.load %arg7[%c0_6, %c0_7] : memref<8x160xf32, #tpu.memory_space<vmem>>, vector<8x160xf32>
      %12 = arith.maximumf %11, %1 : vector<8x160xf32>
      %c0_8 = arith.constant 0 : index
      %c0_9 = arith.constant 0 : index
      %13 = vector.load %arg7[%c0_8, %c0_9] : memref<8x160xf32, #tpu.memory_space<vmem>>, vector<8x160xf32>
      tpu.vector_store %arg7[%c0_8, %c0_9], %12 {strides = array<i32>} : memref<8x160xf32, #tpu.memory_space<vmem>>, vector<8x160xf32>,
    } else {
    }
    %c2_i32 = arith.constant 2 : i32
    %8 = arith.cmpi eq, %arg1, %c2_i32 : i32
    %9 = arith.extui %8 : i1 to i32
    %c0_i32_5 = arith.constant 0 : i32
    %10 = arith.cmpi ne, %9, %c0_i32_5 : i32
    scf.if %10 {
      %c0_6 = arith.constant 0 : index
      %c0_7 = arith.constant 0 : index
      %11 = vector.load %arg3[%c0_6, %c0_7] : memref<8x160xf32, #tpu.memory_space<vmem>>, vector<8x160xf32>
      %c0_8 = arith.constant 0 : index
      %c0_9 = arith.constant 0 : index
      %12 = vector.load %arg2[%c0_8, %c0_9] : memref<8x160xf32, #tpu.memory_space<vmem>>, vector<8x160xf32>
      %c0_10 = arith.constant 0 : index
      %c0_11 = arith.constant 0 : index
      %13 = vector.load %arg7[%c0_10, %c0_11] : memref<8x160xf32, #tpu.memory_space<vmem>>, vector<8x160xf32>
      %cst_12 = arith.constant 0.000000e+00 : f32
      %14 = vector.broadcast %cst_12 : f32 to vector<8x160xf32>
      %15 = arith.maximumf %12, %14 : vector<8x160xf32>
      %16 = arith.mulf %12, %11 : vector<8x160xf32>
      %17 = arith.subf %15, %16 : vector<8x160xf32>
      %18 = math.absf %12 : vector<8x160xf32>
      %cst_13 = arith.constant 0.000000e+00 : f32
      %19 = vector.broadcast %cst_13 : f32 to vector<8x160xf32>
      %20 = arith.subf %19, %18 : vector<8x160xf32>
      %21 = math.exp %20 : vector<8x160xf32>
      %22 = math.log1p %21 : vector<8x160xf32>
      %23 = arith.addf %17, %22 : vector<8x160xf32>
      %24 = vector.shape_cast %23 : vector<8x160xf32> to vector<1x8x160xf32>
      %cst_14 = arith.constant dense<0.000000e+00> : vector<1xf32>
      %25 = vector.multi_reduction <add>, %24, %cst_14 [1, 2] : vector<1x8x160xf32> to vector<1xf32>
      %26 = vector.shape_cast %25 : vector<1xf32> to vector<1x1x1xf32>
      %27 = vector.extract %26[0, 0, 0] : f32 from vector<1x1x1xf32>
      %28 = vector.broadcast %27 : f32 to vector<1x8x128xf32>
      %c0_15 = arith.constant 0 : index
      %c0_16 = arith.constant 0 : index
      %c0_17 = arith.constant 0 : index
      %29 = vector.load %arg5[%c0_15, %c0_16, %c0_17] : memref<1x8x128xf32, #tpu.memory_space<vmem>>, vector<1x8x128xf32>
      tpu.vector_store %arg5[%c0_15, %c0_16, %c0_17], %28 {strides = array<i32>} : memref<1x8x128xf32, #tpu.memory_space<vmem>>, vector<1x8x128xf32>,
      %cst_18 = arith.constant 0.000000e+00 : f32
      %30 = vector.broadcast %cst_18 : f32 to vector<8x160xf32>
      %31 = arith.maximumf %13, %30 : vector<8x160xf32>
      %32 = arith.mulf %13, %11 : vector<8x160xf32>
      %33 = arith.subf %31, %32 : vector<8x160xf32>
      %34 = math.absf %13 : vector<8x160xf32>
      %cst_19 = arith.constant 0.000000e+00 : f32
      %35 = vector.broadcast %cst_19 : f32 to vector<8x160xf32>
      %36 = arith.subf %35, %34 : vector<8x160xf32>
      %37 = math.exp %36 : vector<8x160xf32>
      %38 = math.log1p %37 : vector<8x160xf32>
      %39 = arith.addf %33, %38 : vector<8x160xf32>
      %40 = vector.shape_cast %39 : vector<8x160xf32> to vector<1x8x160xf32>
      %cst_20 = arith.constant dense<0.000000e+00> : vector<1xf32>
      %41 = vector.multi_reduction <add>, %40, %cst_20 [1, 2] : vector<1x8x160xf32> to vector<1xf32>
      %42 = vector.shape_cast %41 : vector<1xf32> to vector<1x1x1xf32>
      %43 = vector.extract %42[0, 0, 0] : f32 from vector<1x1x1xf32>
      %44 = vector.broadcast %43 : f32 to vector<1x8x128xf32>
      %c0_21 = arith.constant 0 : index
      %c0_22 = arith.constant 0 : index
      %c0_23 = arith.constant 0 : index
      %45 = vector.load %arg6[%c0_21, %c0_22, %c0_23] : memref<1x8x128xf32, #tpu.memory_space<vmem>>, vector<1x8x128xf32>
      tpu.vector_store %arg6[%c0_21, %c0_22, %c0_23], %44 {strides = array<i32>} : memref<1x8x128xf32, #tpu.memory_space<vmem>>, vector<1x8x128xf32>,
    } else {
    }
    return
  }
  func.func @transform_0(%arg0: i32, %arg1: i32) -> (i32, i32) {
    %c0_i32 = arith.constant 0 : i32
    %c0_i32_0 = arith.constant 0 : i32
    return %arg0, %c0_i32 : i32, i32
  }
  func.func @transform_1(%arg0: i32, %arg1: i32) -> (i32, i32) {
    %c0_i32 = arith.constant 0 : i32
    %c0_i32_0 = arith.constant 0 : i32
    return %arg0, %c0_i32 : i32, i32
  }
  func.func @transform_2(%arg0: i32, %arg1: i32) -> (i32, i32, i32) {
    %c0_i32 = arith.constant 0 : i32
    %c0_i32_0 = arith.constant 0 : i32
    return %arg0, %arg1, %c0_i32 : i32, i32, i32
  }
  func.func @transform_3(%arg0: i32, %arg1: i32) -> (i32, i32, i32) {
    %c0_i32 = arith.constant 0 : i32
    %c0_i32_0 = arith.constant 0 : i32
    %c0_i32_1 = arith.constant 0 : i32
    return %arg0, %c0_i32, %c0_i32_0 : i32, i32, i32
  }
  func.func @transform_4(%arg0: i32, %arg1: i32) -> (i32, i32, i32) {
    %c0_i32 = arith.constant 0 : i32
    %c0_i32_0 = arith.constant 0 : i32
    %c0_i32_1 = arith.constant 0 : i32
    return %arg0, %c0_i32, %c0_i32_0 : i32, i32, i32
  }
}

</mosaic_0001>

<bundles_post_ra>
// kernel: tpu_custom_call.1
= control target key start
LH: loop header
LB: loop body
LE: loop exit
PB: predicated region body
PF: predicated region fallthrough
CT: control target
= control target key end

     0   :  { %s1766_s0 = inlined_call_operand.hbm [shape: f32[16,160], index: 0, kind: input, shape index: {}]   ;;  %s1767_s1 = inlined_call_operand.hbm [shape: f32[16,160], index: 1, kind: input, shape index: {}]   ;;  %s1768_s2 = inlined_call_operand.hbm [shape: f32[16,24,160], index: 2, kind: input, shape index: {}]   ;;  %s1769_s3 = inlined_call_operand.hbm [shape: f32[2,8,128], index: 3, kind: output, shape index: {0}]   ;;  %s1770_s4 = inlined_call_operand.hbm [shape: f32[2,8,128], index: 4, kind: output, shape index: {1}]  }
   0x1   :  { %1784 = sst [smem:[#allocation24_spill]] %s1767_s1 }
   0x2   :  { %1785 = sst [smem:[#allocation25_spill]] %s1769_s3 }
   0x3   :  { %1786 = sst [smem:[#allocation26_spill]] %s1770_s4 }
   0x4   :  { %10 = vsyncpa [#allocation4], 0 }
   0x5   :  { %12 = vsyncpa [#allocation4 + $0x1], 0 }
   0x6   :  { %13 = vsyncpa [#allocation7], 0 }
   0x7   :  { %15 = vsyncpa [#allocation7 + $0x1], 0 }
   0x8   :  { %16 = vsyncpa [#allocation5], 0 }
   0x9   :  { %18 = vsyncpa [#allocation5 + $0x1], 0 }
   0xa   :  { %19 = vsyncpa [#allocation11], 0 }
   0xb   :  { %21 = vsyncpa [#allocation11 + $0x1], 0  ;;  %s1288_s15 = smov 0   ;;  %s1290_s16 = smov 0  }
   0xc   :  { %s1292_s17 = smov 0   ;;  %s1294_s18 = smov 0  }
   0xd   :  { %s1296_s19 = smov 0   ;;  %s1298_s20 = smov 0  }
   0xe   :  { %s1300_s21 = smov 0   ;;  %s1302_s22 = smov 0  }
   0xf   :  { %s1304_s23 = smov 0   ;;  %s1306_s24 = smov 0  }
  0x10   :  { %s1308_s25 = smov 0  }
  0x11 LB: > { %1787 = sst [smem:[#allocation17_spill]] %s1225_s18  ;;  %s1344_s26 = sadd.s32 4294967295, %s1253_s25   ;;  %s1253_s25 = sphi %s1308_s25, %s27_s25   ;;  %s1249_s24 = sphi %s1306_s24, %s1832_s24   ;;  %s1245_s23 = sphi %s1304_s23, %s1831_s23   ;;  %s1241_s22 = sphi %s1302_s22, %s1830_s22   ;;  %s1237_s21 = sphi %s1300_s21, %s1829_s21   ;;  %s1233_s20 = sphi %s1298_s20, %s1828_s20   ;;  %s1229_s19 = sphi %s1296_s19, %s1827_s19   ;;  %s1225_s18 = sphi %s1294_s18, %s1826_s18   ;;  %s1221_s17 = sphi %s1292_s17, %s1825_s17   ;;  %s1217_s16 = sphi %s1290_s16, %s1824_s16   ;;  %s1213_s15 = sphi %s1288_s15, %s1823_s15  }
  0x12   : > { %1788 = sst [smem:[#allocation18_spill]] %s1253_s25  ;;  %s829_s27 = sadd.s32 4294967294, %s1253_s25  }
  0x13   : > { %s36_s28 = sadd.s32 1, %s1245_s23  ;;  %s39_s29 = sadd.s32 1, %s1249_s24 }
  0x14   : > { %p37_p0 = scmp.ge.s32.totalorder %s36_s28, 3  ;;  %s46_s30 = sadd.s32 1, %s1233_s20 }
  0x15   : > { %p53_p1 = scmp.ne.s32.totalorder %s1233_s20, %s1229_s19  ;;  %p54_p2 = scmp.eq.s32.totalorder %s1253_s25, 0 }
  0x16   : > { %s1834_s28 = smov (%p37_p0, %s36_s28), 0  ;;  %s1836_s29 = smov (!%p37_p0, %s39_s29), %s1249_s24 }
  0x17   : > { %1789 = sst [smem:[#allocation19_spill]] %s1834_s28  ;;  %p1361_p3 = por %p54_p2, %p53_p1 }
  0x18   : > { %p1771_p4 = scmp.ne.s32.totalorder %s1229_s19, %s1225_s18  ;;  %p41_p5 = scmp.ge.s32.totalorder %s1836_s29, 2 }
  0x19   : > { %p60_p6 = scmp.eq.s32.totalorder %s1344_s26, 0  ;;  %s96_s6 = ssub.s32 %s1245_s23, %s1834_s28 }
  0x1a   : > { %s100_s7 = sadd.s32 1, %s1221_s17  ;;  %s1838_s29 = smov (%p41_p5, %s1836_s29), 0 }
  0x1b   : > { %1791 = sst [smem:[#allocation20_spill]] %s1838_s29  ;;  %p1378_p7 = por %p60_p6, %p1771_p4 }
  0x1c   : > { %p107_p8 = scmp.ne.s32.totalorder %s1221_s17, %s1217_s16  ;;  %s43_s9 = ssub.s32 %s1249_s24, %s1838_s29 }
  0x1d   : > { %s1792_s8 = scalar_select %p1378_p7, 1, 0 }
  0x1e   : > { %p113_p9 = scmp.ne.s32.totalorder %s1217_s16, %s1213_s15  ;;  %p44_p10 = scmp.eq.s32.totalorder %s43_s9, 0 }
  0x1f   : > { %s97_s10 = sor.u32 %s96_s6, %s43_s9  ;;  %p1390_p12 = por %p107_p8, %p54_p2 }
  0x20   : > { %p98_p11 = scmp.eq.s32.totalorder %s97_s10, 0  ;;  %p1402_p13 = por %p113_p9, %p60_p6 }
  0x21   : > { %s1395_s12 = scalar_select %p44_p10, %s1233_s20, %s46_s30  }
  0x22   : > { %s1398_s13 = scalar_select %p98_p11, %s1221_s17, %s100_s7  }
  0x23   : > { %1794 = sst [smem:[#allocation21_spill]] %s1395_s12  ;;  %p137_p0 = scmp.eq.s32.totalorder %s1344_s26, 5 }
  0x24   : > { %1795 = sst [smem:[#allocation22_spill]] %s1398_s13  ;;  %p143_p5 = scmp.eq.s32.totalorder %s829_s27, 5 }
  0x25   : > { %s1796_s14 = scalar_select %p1402_p13, 1, 0 }
  0x26   : > { %p1410_p4 = por %p137_p0, %p53_p1  ;;  %p892_p2 = scmp.lt.s32.totalorder %s1253_s25, 6 }
  0x27   : > { %p1798_p8 = scmp.ne.s32.totalorder %s1229_s19, %s1225_s18  ;;  %s1774_s6 = sand.u32 1, %s1233_s20  }
  0x28   : > { %s1797_s15 = scalar_select %p1410_p4, 1, 0 }
  0x29   : > { %p1418_p10 = por %p143_p5, %p1798_p8  ;;  %s1425_s7 = sshll.u32 %s1774_s6, 4 }
  0x2a   : > { %s858_s9 = sshll.u32 %s1249_s24, 8  ;;  %p1430_p6 = pnand %p892_p2, %p1361_p3 }
  0x2b   : > { %s1799_s30 = scalar_select %p1418_p10, 1, 0 }
  0x2c   : > { %s208_s10 = sand.u32 1, %s1253_s25   ;;  %s1802_s1 = sld [smem:[#allocation24_spill]] }
  0x2d   : > { %1800 = sst [smem:[#allocation23_spill]] %s1799_s30  ;;  %s212_s6 = scalar_lea.vmem [#allocation6], %s1425_s7 }
  0x2e   : > { %s220_s13 = sshll.u32 %s212_s6, 4  ;;  %p1448_p1 = pnand %p892_p2, %p1390_p12  ;;  %s1444_s13 = int_to_ptr.vmem [resolvable:$true] %s220_s13 }
  0x2f   : > { %s1452_s18 = scalar_lea.sflag [#allocation7], %s208_s10  ;;  %p1003_p9 = pneg %p1430_p6 }
  0x32   : > { %s1440_s12 = scalar_lea.hbm %s1802_s1, %s858_s9  ;;  %s1006_s6 = scalar_lea.hbm %s1802_s1, 512 }
  0x33   : > { %s1001_s4 = scalar_lea.hbm %s1440_s12, 256  ;;  %p1007_p12 = scmp.lt.u32.totalorder %s1440_s12, %s1802_s1 }
  0x34   : > { %p1002_p3 = scmp.ne.s32.totalorder %s1440_s12, %s1001_s4  ;;  %p1008_p5 = scmp.lt.u32.totalorder %s1006_s6, %s1001_s4 }
  0x35   : > { %p1010_p8 = scmp.lt.u32.totalorder %s1001_s4, %s1440_s12 }
  0x36   : > { %p1004_p11 = pnand %p1003_p9, %p1002_p3  ;;  %p1009_p2 = por %p1008_p5, %p1007_p12 }
  0x38   : > { %p1005_p0 = pneg %p1004_p11  ;;  %p1011_p10 = por %p1010_p8, %p1009_p2 }
  0x3a   : > { %p1012_p4 = pnand %p1011_p10, %p1005_p0 }
  0x3c   : > { %1015 = shalt.err (!%p1012_p4)
}
  0x3d   : > { %s1016_s10 = scalar_lea.vmem %s1444_s13, 256  ;;  %s1255_s28 = smov [#allocation6]  }
  0x3e   : > { %p1017_p3 = scmp.ne.s32.totalorder %s1444_s13, %s1016_s10  ;;  %s1021_s29 = sshll.u32 %s1255_s28, 4  ;;  %s1022_s29 = int_to_ptr.vmem [resolvable:$false] %s1021_s29 }
  0x3f   : > { %s1023_s5 = scalar_lea.vmem %s1022_s29, 512  ;;  %p1024_p7 = scmp.lt.s32.totalorder %s1444_s13, %s1022_s29 }
  0x40   : > { %p1019_p11 = pnand %p1017_p3, %p1003_p9  ;;  %p1025_p12 = scmp.lt.s32.totalorder %s1023_s5, %s1016_s10 }
  0x42   : > { %p1020_p13 = pneg %p1019_p11  ;;  %p1026_p5 = por %p1025_p12, %p1024_p7 }
  0x44   : > { %p1027_p2 = pnand %p1026_p5, %p1020_p13 }
  0x46   : > { %1030 = shalt.err (!%p1027_p2)
}
  0x47   : > { %881 = dma.hbm_to_vmem [thread:$0]  (!%p1430_p6), %s1440_s12, 256, %s1444_s13, %s1452_s18  }
  0x48   : > { %p843_p4 = scmp.ge.s32.totalorder %s1253_s25, 1  ;;  %p249_p10 = scmp.lt.s32.totalorder %s1253_s25, 7 }
  0x49   : > { %s1491_s10 = scalar_lea.hbm %s1766_s0, %s858_s9  ;;  %s193_s28 = scalar_lea.vmem [#allocation3], %s1425_s7 }
  0x4a   : > { %p1482_p0 = pnand %p843_p4, %p249_p10  ;;  %s201_s29 = sshll.u32 %s193_s28, 4  ;;  %s1494_s29 = int_to_ptr.vmem [resolvable:$true] %s201_s29 }
  0x4b   : > { %s229_s12 = sand.u32 1, %s1221_s17   ;;  %s1805_s13 = sand.u32 1, %s1233_s20  }
  0x4c   : > { %s1804_s4 = scalar_select %p1482_p0, 1, 0 }
  0x4d   : > { %s190_s5 = scalar_lea.sflag [#allocation4], %s1805_s13  ;;  %s1031_s1 = scalar_lea.hbm %s1491_s10, 256 }
  0x4e   : > { %p1032_p7 = scmp.ne.s32.totalorder %s1491_s10, %s1031_s1  ;;  %s1036_s11 = scalar_lea.hbm %s1766_s0, 512 }
  0x4f   : > { %p1037_p3 = scmp.lt.u32.totalorder %s1491_s10, %s1766_s0  ;;  %p1038_p11 = scmp.lt.u32.totalorder %s1036_s11, %s1031_s1 }
  0x50   : > { %p1034_p13 = pnand %p1032_p7, %p1003_p9  ;;  %p1040_p5 = scmp.lt.u32.totalorder %s1031_s1, %s1491_s10 }
  0x51   : > { %p1039_p12 = por %p1038_p11, %p1037_p3 }
  0x52   : > { %p1035_p8 = pneg %p1034_p13 }
  0x53   : > { %p1041_p2 = por %p1040_p5, %p1039_p12 }
  0x55   : > { %p1042_p4 = pnand %p1041_p2, %p1035_p8 }
  0x57   : > { %1045 = shalt.err (!%p1042_p4)
}
  0x58   : > { %s1046_s7 = scalar_lea.vmem %s1494_s29, 256  ;;  %s1256_s28 = smov [#allocation3]  }
  0x59   : > { %p1047_p10 = scmp.ne.s32.totalorder %s1494_s29, %s1046_s7  ;;  %s1051_s13 = sshll.u32 %s1256_s28, 4  ;;  %s1052_s13 = int_to_ptr.vmem [resolvable:$false] %s1051_s13 }
  0x5a   : > { %s1053_s3 = scalar_lea.vmem %s1052_s13, 512  ;;  %p1054_p0 = scmp.lt.s32.totalorder %s1494_s29, %s1052_s13 }
  0x5b   : > { %p1049_p7 = pnand %p1047_p10, %p1003_p9  ;;  %p1055_p3 = scmp.lt.s32.totalorder %s1053_s3, %s1046_s7 }
  0x5d   : > { %p1050_p13 = pneg %p1049_p7  ;;  %p1056_p11 = por %p1055_p3, %p1054_p0 }
  0x5f   : > { %p1057_p12 = pnand %p1056_p11, %p1050_p13 }
  0x61   : > { %1060 = shalt.err (!%p1057_p12)
}
  0x62   : > { %878 = dma.hbm_to_vmem [thread:$0]  (!%p1430_p6), %s1491_s10, 256, %s1494_s29, %s190_s5  }
  0x63   : > { %s838_s1 = sshll.u32 %s229_s12, 7  ;;  %s840_s25 = sshll.u32 %s1245_s23, 1 }
  0x64   : > { %s1806_s6 = smul.u32 48, %s1249_s24  ;;  %s231_s7 = scalar_lea.vmem [#allocation8], %s838_s1 }
  0x65   : > { %s241_s28 = sshll.u32 %s231_s7, 4  ;;  %p1063_p9 = pneg %p1448_p1  ;;  %s1532_s28 = int_to_ptr.vmem [resolvable:$true] %s241_s28 }
  0x66   : > { %s238_s9 = sadd.s32 %s1806_s6, %s840_s25  ;;  %s1066_s5 = scalar_lea.hbm %s1768_s2, 12288 }
  0x67   : > { %s842_s11 = sshll.u32 %s238_s9, 7 }
  0x68   : > { %s1530_s27 = scalar_lea.hbm %s1768_s2, %s842_s11 }
  0x69   : > { %s1061_s10 = scalar_lea.hbm %s1530_s27, 2048  ;;  %p1067_p5 = scmp.lt.u32.totalorder %s1530_s27, %s1768_s2 }
  0x6a   : > { %p1062_p6 = scmp.ne.s32.totalorder %s1530_s27, %s1061_s10  ;;  %p1068_p2 = scmp.lt.u32.totalorder %s1066_s5, %s1061_s10 }
  0x6b   : > { %p1070_p10 = scmp.lt.u32.totalorder %s1061_s10, %s1530_s27 }
  0x6c   : > { %p1064_p0 = pnand %p1063_p9, %p1062_p6  ;;  %p1069_p4 = por %p1068_p2, %p1067_p5 }
  0x6e   : > { %p1065_p8 = pneg %p1064_p0  ;;  %p1071_p7 = por %p1070_p10, %p1069_p4 }
  0x70   : > { %p1072_p13 = pnand %p1071_p7, %p1065_p8 }
  0x72   : > { %1075 = shalt.err (!%p1072_p13)
}
  0x73   : > { %s1076_s6 = scalar_lea.vmem %s1532_s28, 2048  ;;  %s1257_s9 = smov [#allocation8]  }
  0x74   : > { %p1077_p3 = scmp.ne.s32.totalorder %s1532_s28, %s1076_s6  ;;  %s1081_s11 = sshll.u32 %s1257_s9, 4  ;;  %s1082_s11 = int_to_ptr.vmem [resolvable:$false] %s1081_s11 }
  0x75   : > { %s1083_s7 = scalar_lea.vmem %s1082_s11, 4096  ;;  %p1084_p6 = scmp.lt.s32.totalorder %s1532_s28, %s1082_s11 }
  0x76   : > { %p1079_p11 = pnand %p1077_p3, %p1063_p9  ;;  %p1085_p0 = scmp.lt.s32.totalorder %s1083_s7, %s1076_s6 }
  0x78   : > { %p1080_p12 = pneg %p1079_p11  ;;  %p1086_p5 = por %p1085_p0, %p1084_p6 }
  0x7a   : > { %p1087_p2 = pnand %p1086_p5, %p1080_p12 }
  0x7c   : > { %1090 = shalt.err (!%p1087_p2)
}
  0x7d   : > { %s1258_s13 = smov 768   ;;  %s1259_s3 = smov 256  }
  0x7e   : > { %s1260_s10 = smov 16   ;;  %p1807_p9 = scmp.ne.s32.totalorder %s1804_s4, 0 }
  0x7f   : > { %884 = dma.hbm_to_vmem [thread:$0]  (!%p1448_p1), %s1530_s27, 2048, %s1532_s28, %s1452_s18, %s1258_s13, %s1259_s3, %s1260_s10  }
  0x80   : > { %253 = sbr.rel (%p1807_p9) target bundleno = 494 (0x1ee), region = 32  ;;  %s1563_s29 = sand.u32 (!%p1807_p9), 1, %s1229_s19  }
  0x81   : > { %s844_s12 = sshll.u32 (!%p1807_p9), %s1563_s29, 4  ;;  %s256_s5 = scalar_lea.sflag (!%p1807_p9), [#allocation4], %s1563_s29 }
  0x82   : > { %s1567_s1 = scalar_lea.vmem (!%p1807_p9), [#allocation3], %s844_s12  ;;  %p1808_p8 = scmp.ne.s32.totalorder (!%p1807_p9), %s1792_s8, 0 }
  0x87   : > { %1192 = dma.done.wait (%p1808_p8), %s256_s5, 256  }
  0x88   : > { %1194 = vsyncadd (%p1808_p8), %s256_s5, 4294967040  ;;  %s264_s18 = sand.u32 1, %s1344_s26   ;;  %s1574_s4 = scalar_lea.vmem [#allocation6], %s844_s12 }
  0x89   : > { %s265_s30 = scalar_lea.sflag [#allocation7], %s264_s18 }
  0x8a   : > { %1196 = dma.done.wait (%p1808_p8), %s265_s30, 256  }
  0x8b   : > { %1198 = vsyncadd (%p1808_p8), %s265_s30, 4294967040  ;;  %s275_s28 = sand.u32 1, %s1217_s16   ;;  %p1809_p1 = scmp.ne.s32.totalorder %s1796_s14, 0 }
  0x8c   : > { %s846_s27 = sshll.u32 %s275_s28, 7 }
  0x8d   : > { %s1581_s25 = scalar_lea.vmem [#allocation8], %s846_s27 }
  0x8e   : > { %1200 = dma.done.wait (%p1809_p1), %s265_s30, 2048  }
  0x8f   : > { %1202 = vsyncadd (%p1809_p1), %s265_s30, 4294965248  ;;  %s847_s26 = sshll.u32 %s1563_s29, 3  ;;  %vm340_vm0 = vcmask 261120   ;;  %v318_v0 = vld [vmem:[%s1581_s25] sm:$0xff]  ;;  %v319_v1 = vld [vmem:[%s1581_s25 + $0x8] sm:$0xff]  ;;  %p849_p4 = scmp.ne.s32.totalorder %s1237_s21, 0 }
  0x90   : > { %v320_v2 = vld [vmem:[%s1581_s25 + $0x10] sm:$0xff]  ;;  %v321_v3 = vld [vmem:[%s1581_s25 + $0x18] sm:$0xff]  ;;  %v322_v4 = vld [vmem:[%s1581_s25 + $0x20] sm:$0xff]  ;;  %v334_v6 = vrot.slane %v318_v0, 4  ;;  %v341_v7 = vsel %vm340_vm0, %v319_v1, -inf  ;;  %s1630_s8 = scalar_lea.vmem [#allocation9], %s847_s26 }
  0x91   : > { %v323_v5 = vld [vmem:[%s1581_s25 + $0x28] sm:$0xff]  ;;  %v348_v8 = vrot.slane %v320_v2, 4  ;;  %v324_v9 = vld [vmem:[%s1581_s25 + $0x30] sm:$0xff]  ;;  %v325_v10 = vld [vmem:[%s1581_s25 + $0x38] sm:$0xff]  ;;  %v342_v11 = vrot.slane %v341_v7, 4  ;;  %v354_v12 = vsel %vm340_vm0, %v321_v3, -inf }
  0x92   : > { %v361_v13 = vrot.slane %v322_v4, 4  ;;  %v335_v14 = vmax.f32 %v318_v0, %v334_v6  ;;  %v355_v16 = vrot.slane %v354_v12, 4  ;;  %v367_v17 = vsel %vm340_vm0, %v323_v5, -inf  ;;  %v326_v42 = vld [vmem:[%s1581_s25 + $0x40] sm:$0xff]  ;;  %v327_v43 = vld [vmem:[%s1581_s25 + $0x48] sm:$0xff]  ;;  %v328_v48 = vld [vmem:[%s1581_s25 + $0x50] sm:$0xff] }
  0x93   : > { %v349_v15 = vmax.f32 %v320_v2, %v348_v8  ;;  %v343_v18 = vmax.f32 %v341_v7, %v342_v11  ;;  %v368_v20 = vrot.slane %v367_v17, 4  ;;  %v374_v21 = vrot.slane %v324_v9, 4  ;;  %v329_v53 = vld [vmem:[%s1581_s25 + $0x58] sm:$0xff]  ;;  %v330_v54 = vld [vmem:[%s1581_s25 + $0x60] sm:$0xff]  ;;  %v331_v59 = vld [vmem:[%s1581_s25 + $0x68] sm:$0xff]  ;;  %s1634_s14 = scalar_lea.vmem [#allocation10], %s847_s26 }
  0x94   : > { %v362_v19 = vmax.f32 %v322_v4, %v361_v13  ;;  %v336_v22 = vrot.slane %v335_v14, 2  ;;  %v356_v24 = vmax.f32 %v354_v12, %v355_v16  ;;  %v380_v25 = vsel %vm340_vm0, %v325_v10, -inf  ;;  %v332_v4 = vld [vmem:[%s1581_s25 + $0x70] sm:$0xff] }
  0x95   : > { %v350_v23 = vrot.slane %v349_v15, 2  ;;  %v344_v26 = vrot.slane %v343_v18, 2  ;;  %v369_v28 = vmax.f32 %v367_v17, %v368_v20  ;;  %v375_v29 = vmax.f32 %v324_v9, %v374_v21  ;;  %v333_v9 = vld [vmem:[%s1581_s25 + $0x78] sm:$0xff] }
  0x96   : > { %v363_v27 = vrot.slane %v362_v19, 2  ;;  %v337_v30 = vmax.f32 %v335_v14, %v336_v22  ;;  %v357_v32 = vrot.slane %v356_v24, 2  ;;  %v381_v33 = vrot.slane %v380_v25, 4 }
  0x97   : > { %v351_v31 = vmax.f32 %v349_v15, %v350_v23  ;;  %v345_v34 = vmax.f32 %v343_v18, %v344_v26  ;;  %v370_v36 = vrot.slane %v369_v28, 2  ;;  %v376_v37 = vrot.slane %v375_v29, 2 }
  0x98   : > { %v364_v35 = vmax.f32 %v362_v19, %v363_v27  ;;  %v338_v38 = vrot.slane %v337_v30, 1  ;;  %v358_v40 = vmax.f32 %v356_v24, %v357_v32  ;;  %v382_v41 = vmax.f32 %v380_v25, %v381_v33 }
  0x99   : > { %v352_v39 = vrot.slane %v351_v31, 1  ;;  %v346_v44 = vrot.slane %v345_v34, 1  ;;  %v371_v46 = vmax.f32 %v369_v28, %v370_v36  ;;  %v377_v47 = vmax.f32 %v375_v29, %v376_v37 }
  0x9a   : > { %v365_v45 = vrot.slane %v364_v35, 1  ;;  %v1603_v49 = vmax.f32 %v337_v30, %v338_v38  ;;  %v359_v51 = vrot.slane %v358_v40, 1  ;;  %v383_v52 = vrot.slane %v382_v41, 2 }
  0x9b   : > { %v1605_v50 = vmax.f32 %v351_v31, %v352_v39  ;;  %v1609_v55 = vmax.f32 %v345_v34, %v346_v44  ;;  %v372_v57 = vrot.slane %v371_v46, 1  ;;  %v378_v58 = vrot.slane %v377_v47, 1 }
  0x9c   : > { %v1611_v56 = vmax.f32 %v364_v35, %v365_v45  ;;  %v1614_v60 = vmax.f32 %v358_v40, %v359_v51  ;;  %v384_v61 = vmax.f32 %v382_v41, %v383_v52  ;;  %v387_v62 = vrot.slane %v326_v42, 4 }
  0x9d   : > { %v393_v63 = vsel %vm340_vm0, %v327_v43, -inf  ;;  %v1617_v0 = vmax.f32 %v371_v46, %v372_v57  ;;  %v1619_v1 = vmax.f32 %v377_v47, %v378_v58  ;;  %v400_v3 = vrot.slane %v328_v48, 4 }
  0x9e   : > { %v394_v2 = vrot.slane %v393_v63, 4  ;;  %v385_v5 = vrot.slane %v384_v61, 1  ;;  %v388_v6 = vmax.f32 %v326_v42, %v387_v62  ;;  %v406_v7 = vsel %vm340_vm0, %v329_v53, -inf }
  0x9f   : > { %v413_v8 = vrot.slane %v330_v54, 4  ;;  %v401_v11 = vmax.f32 %v328_v48, %v400_v3  ;;  %v407_v12 = vrot.slane %v406_v7, 4  ;;  %v419_v13 = vsel %vm340_vm0, %v331_v59, -inf }
  0xa0   : > { %v395_v10 = vmax.f32 %v393_v63, %v394_v2  ;;  %v1625_v14 = vmax.f32 %v384_v61, %v385_v5  ;;  %v389_v15 = vrot.slane %v388_v6, 2  ;;  %v420_v17 = vrot.slane %v419_v13, 4 }
  0xa1   : > { %v414_v16 = vmax.f32 %v330_v54, %v413_v8  ;;  %v402_v19 = vrot.slane %v401_v11, 2  ;;  %v408_v20 = vmax.f32 %v406_v7, %v407_v12  ;;  %v426_v21 = vrot.slane %v332_v4, 4 }
  0xa2   : > { %v396_v18 = vrot.slane %v395_v10, 2  ;;  %v390_v22 = vmax.f32 %v388_v6, %v389_v15  ;;  %v421_v24 = vmax.f32 %v419_v13, %v420_v17  ;;  %v432_v25 = vsel %vm340_vm0, %v333_v9, -inf }
  0xa3   : > { %v415_v23 = vrot.slane %v414_v16, 2  ;;  %v403_v27 = vmax.f32 %v401_v11, %v402_v19  ;;  %v409_v28 = vrot.slane %v408_v20, 2  ;;  %v427_v29 = vmax.f32 %v332_v4, %v426_v21 }
  0xa4   : > { %v397_v26 = vmax.f32 %v395_v10, %v396_v18  ;;  %v391_v30 = vrot.slane %v390_v22, 1  ;;  %v422_v32 = vrot.slane %v421_v24, 2  ;;  %v433_v33 = vrot.slane %v432_v25, 4 }
  0xa5   : > { %v416_v31 = vmax.f32 %v414_v16, %v415_v23  ;;  %v404_v35 = vrot.slane %v403_v27, 1  ;;  %v410_v36 = vmax.f32 %v408_v20, %v409_v28  ;;  %v428_v37 = vrot.slane %v427_v29, 2 }
  0xa6   : > { %v398_v34 = vrot.slane %v397_v26, 1  ;;  %v392_v38 = vmax.f32 %v390_v22, %v391_v30  ;;  %v423_v40 = vmax.f32 %v421_v24, %v422_v32  ;;  %v434_v41 = vmax.f32 %v432_v25, %v433_v33 }
  0xa7   : > { %v417_v39 = vrot.slane %v416_v31, 1  ;;  %v405_v43 = vmax.f32 %v403_v27, %v404_v35  ;;  %v411_v44 = vrot.slane %v410_v36, 1  ;;  %v429_v45 = vmax.f32 %v427_v29, %v428_v37 }
  0xa8   : > { %v399_v42 = vmax.f32 %v397_v26, %v398_v34  ;;  %v424_v47 = vrot.slane %v423_v40, 1  ;;  %v435_v48 = vrot.slane %v434_v41, 2  ;;  %442 = sbr.rel (%p849_p4) target bundleno = 180 (0xb4), region = 48  ;;  %vm459_vm1 = vcmask (!%p849_p4), 1041409  }
  0xa9   : > { %v418_v46 = vmax.f32 %v416_v31, %v417_v39  ;;  %v412_v51 = vmax.f32 %v410_v36, %v411_v44  ;;  %v430_v52 = vrot.slane %v429_v45, 1  ;;  %vm461_vm2 = vcmask (!%p849_p4), 1042434  }
  0xaa   : > { %v425_v53 = vmax.f32 %v423_v40, %v424_v47  ;;  %v436_v54 = vmax.f32 %v434_v41, %v435_v48  ;;  %vm463_vm3 = vcmask (!%p849_p4), 1043459   ;;  %v460_v61 = vsel (!%p849_p4), %vm459_vm1, %v1605_v50, %v1603_v49 }
  0xab   : > { %v431_v57 = vmax.f32 %v429_v45, %v430_v52  ;;  %vm465_vm4 = vcmask (!%p849_p4), 1044484   ;;  %v462_v62 = vsel (!%p849_p4), %vm461_vm2, %v1611_v56, %v460_v61  ;;  %vm467_vm5 = vcmask (!%p849_p4), 1045509  }
  0xac   : > { %v437_v58 = vrot.slane %v436_v54, 1  ;;  %v473_v63 = vsel (!%p849_p4), %vm459_vm1, %v1614_v60, %v1609_v55  ;;  %v464_v2 = vsel (!%p849_p4), %vm463_vm3, %v1619_v1, %v462_v62  ;;  %vm469_vm6 = vcmask (!%p849_p4), 1046534  }
  0xad   : > { %v474_v3 = vsel (!%p849_p4), %vm461_vm2, %v1617_v0, %v473_v63  ;;  %v466_v4 = vsel (!%p849_p4), %vm465_vm4, %v392_v38, %v464_v2  ;;  %vm471_vm7 = vcmask (!%p849_p4), 1047559  }
  0xae   : > { %v438_v59 = vmax.f32 %v436_v54, %v437_v58  ;;  %v475_v5 = vsel (!%p849_p4), %vm463_vm3, %v1625_v14, %v474_v3  ;;  %v468_v6 = vsel (!%p849_p4), %vm467_vm5, %v405_v43, %v466_v4 }
  0xaf   : > { %v476_v7 = vsel %vm465_vm4, %v399_v42, %v475_v5  ;;  %v470_v8 = vsel %vm469_vm6, %v418_v46, %v468_v6 }
  0xb0   : > { %v477_v9 = vsel %vm467_vm5, %v412_v51, %v476_v7  ;;  %v472_v10 = vsel %vm471_vm7, %v431_v57, %v470_v8 }
  0xb1   : > { %v478_v11 = vsel %vm469_vm6, %v425_v53, %v477_v9  ;;  %482 = vst [vmem:[#allocation2] sm:$0xff] %v472_v10 }
  0xb2   : > { %v479_v12 = vsel %vm471_vm7, %v438_v59, %v478_v11 }
  0xb3   : > { %483 = vst.msk [vmem:[#allocation2 + $0x8] sm:$0xff] %vm340_vm0, %v479_v12 }
  0xb4 PF: > { %p850_p10 = scmp.eq.s32.totalorder %s1237_s21, 0 }
  0xb5   : > { %vm506_vm8 = vcmask (!%p850_p10), 1041409   ;;  %vm508_vm9 = vcmask (!%p850_p10), 1042434   ;;  %vm510_vm10 = vcmask (!%p850_p10), 1043459   ;;  %vm512_vm11 = vcmask (!%p850_p10), 1044484  }
  0xb6   : > { %487 = sbr.rel (%p850_p10) target bundleno = 192 (0xc0), region = 52  ;;  %v507_v13 = vsel (!%p850_p10), %vm506_vm8, %v1605_v50, %v1603_v49  ;;  %vm514_vm12 = vcmask (!%p850_p10), 1045509   ;;  %v520_v16 = vsel (!%p850_p10), %vm506_vm8, %v1614_v60, %v1609_v55  ;;  %vm516_vm13 = vcmask (!%p850_p10), 1046534  }
  0xb7   : > { %v509_v15 = vsel (!%p850_p10), %vm508_vm9, %v1611_v56, %v507_v13  ;;  %v521_v18 = vsel (!%p850_p10), %vm508_vm9, %v1617_v0, %v520_v16  ;;  %vm518_vm14 = vcmask (!%p850_p10), 1047559  }
  0xb8   : > { %v511_v17 = vsel (!%p850_p10), %vm510_vm10, %v1619_v1, %v509_v15  ;;  %v522_v20 = vsel (!%p850_p10), %vm510_vm10, %v1625_v14, %v521_v18  ;;  %v488_v21 = vld [vmem:[#allocation2] sm:$0xff] (!%p850_p10) }
  0xb9   : > { %v513_v19 = vsel (!%p850_p10), %vm512_vm11, %v392_v38, %v511_v17  ;;  %v523_v23 = vsel (!%p850_p10), %vm512_vm11, %v399_v42, %v522_v20 }
  0xba   : > { %v515_v22 = vsel (!%p850_p10), %vm514_vm12, %v405_v43, %v513_v19  ;;  %v489_v50 = vld [vmem:[#allocation2 + $0x8] sm:$0xff] (!%p850_p10)  ;;  %v524_v24 = vsel (!%p850_p10), %vm514_vm12, %v412_v51, %v523_v23 }
  0xbb   : > { %v517_v49 = vsel (!%p850_p10), %vm516_vm13, %v418_v46, %v515_v22  ;;  %v525_v25 = vsel (!%p850_p10), %vm516_vm13, %v425_v53, %v524_v24 }
  0xbc   : > { %v519_v56 = vsel (!%p850_p10), %vm518_vm14, %v431_v57, %v517_v49  ;;  %v526_v27 = vsel (!%p850_p10), %vm518_vm14, %v438_v59, %v525_v25 }
  0xbd   : > { %v529_v26 = vmax.f32 %v488_v21, %v519_v56  ;;  %v530_v55 = vmax.f32 %v489_v50, %v526_v27 }
  0xbf   : > { %531 = vst [vmem:[#allocation2] sm:$0xff] %v529_v26  ;;  %532 = vst.msk [vmem:[#allocation2 + $0x8] sm:$0xff] %vm340_vm0, %v530_v55 }
  0xc0 PF: > { %p851_p7 = scmp.ne.s32.totalorder %s1237_s21, 2 }
  0xc1   : > { %v539_v60 = vld [vmem:[%s1567_s1] sm:$0xff] (!%p851_p7)  ;;  %v540_v0 = vld [vmem:[%s1567_s1 + $0x8] sm:$0xff] (!%p851_p7) }
  0xc2   : > { %536 = sbr.rel (%p851_p7) target bundleno = 444 (0x1bc), region = 56  ;;  %v549_v1 = vand.u32 (!%p851_p7), 2147483647, %v539_v60  ;;  %v550_v28 = vand.u32 (!%p851_p7), 2147483647, %v540_v0  ;;  %v537_v52 = vld [vmem:[%s1574_s4] sm:$0xff] (!%p851_p7) }
  0xc3   : > { %v538_v53 = vld [vmem:[%s1574_s4 + $0x8] sm:$0xff] (!%p851_p7)  ;;  %v543_v59 = vmax.f32 (!%p851_p7), %v539_v60, 0.0  ;;  %v545_v61 = vmul.f32 (!%p851_p7), %v539_v60, %v537_v52  ;;  %v544_v2 = vmax.f32 (!%p851_p7), %v540_v0, 0.0 }
  0xc4   : > { %v551_v30 = vsub.f32 (!%p851_p7), 0.0, %v549_v1  ;;  %v552_v31 = vsub.f32 (!%p851_p7), 0.0, %v550_v28  ;;  %v546_v3 = vmul.f32 (!%p851_p7), %v540_v0, %v538_v53 }
  0xc5   : > { %v547_v15 = vsub.f32 (!%p851_p7), %v543_v59, %v545_v61 }
  0xc6   : > { %v541_v14 = vld [vmem:[#allocation2] sm:$0xff] (!%p851_p7)  ;;  %v1659_v29 = vld [vmem:[#allocation2 + $0x8] sm:$0xff] (!%p851_p7)  ;;  %v553_v33 = vmul.f32 (!%p851_p7), 1.442695, %v551_v30  ;;  %v555_v35 = vmul.f32 (!%p851_p7), 1.442695, %v552_v31  ;;  %v548_v20 = vsub.f32 (!%p851_p7), %v544_v2, %v546_v3 }
  0xc7   : > { %v596_v32 = vand.u32 (!%p851_p7), 2147483647, %v541_v14  ;;  %v597_v34 = vand.u32 (!%p851_p7), 2147483647, %v1659_v29  ;;  %v590_v5 = vmax.f32 (!%p851_p7), %v541_v14, 0.0  ;;  %v591_v6 = vmax.f32 (!%p851_p7), %v1659_v29, 0.0 }
  0xc8   : > { %985 = vpow2.f32 (!%p851_p7), %v553_v33  ;;  %v592_v7 = vmul.f32 (!%p851_p7), %v541_v14, %v537_v52  ;;  %v593_v10 = vmul.f32 (!%p851_p7), %v1659_v29, %v538_v53 }
  0xc9   : > { %v598_v36 = vsub.f32 0.0, %v596_v32  ;;  %v599_v37 = vsub.f32 0.0, %v597_v34  ;;  %987 = vpow2.f32 %v555_v35 }
  0xca   : > { %v594_v23 = vsub.f32 %v590_v5, %v592_v7  ;;  %v595_v56 = vsub.f32 %v591_v6, %v593_v10 }
  0xcb   : > { %v600_v38 = vmul.f32 1.442695, %v598_v36  ;;  %v602_v39 = vmul.f32 1.442695, %v599_v37 }
  0xcd   : > { %989 = vpow2.f32 %v600_v38 }
  0xce   : > { %991 = vpow2.f32 %v602_v39 }
  0xd2   : > { %v986_v40 = vpop.eup %985 }
  0xd3   : > { %v988_v41 = vpop.eup %987  ;;  %v557_v42 = vadd.f32 1.0, %v986_v40  ;;  %v560_v46 = vmul.f32 -0.5, %v986_v40  ;;  %v563_v62 = vand.u32 2147483647, %v986_v40 }
  0xd4   : > { %v566_v43 = vadd.f32 1.0, %v988_v41  ;;  %v569_v48 = vmul.f32 -0.5, %v988_v41  ;;  %v572_v4 = vand.u32 2147483647, %v988_v41 }
  0xd5   : > { %993 = vlog2.f32 %v557_v42  ;;  %v561_v57 = vadd.f32 1.0, %v560_v46  ;;  %vm1666_vm15 = vcmp.lt.f32.partialorder %v563_v62, 0.0004427343 }
  0xd6   : > { %995 = vlog2.f32 %v566_v43  ;;  %v570_v63 = vadd.f32 1.0, %v569_v48  ;;  %vm573_vm1 = vcmp.lt.f32.partialorder %v572_v4, 0.0004427343 }
  0xd7   : > { %v990_v44 = vpop.eup %989  ;;  %v562_v9 = vmul.f32 %v986_v40, %v561_v57 }
  0xd8   : > { %v992_v45 = vpop.eup %991  ;;  %v604_v47 = vadd.f32 1.0, %v990_v44  ;;  %v607_v54 = vmul.f32 -0.5, %v990_v44  ;;  %v610_v11 = vand.u32 2147483647, %v990_v44  ;;  %v571_v17 = vmul.f32 %v988_v41, %v570_v63 }
  0xd9   : > { %v613_v51 = vadd.f32 1.0, %v992_v45  ;;  %v616_v58 = vmul.f32 -0.5, %v992_v45  ;;  %v619_v18 = vand.u32 2147483647, %v992_v45 }
  0xda   : > { %997 = vlog2.f32 %v604_v47  ;;  %v608_v8 = vadd.f32 1.0, %v607_v54  ;;  %vm611_vm2 = vcmp.lt.f32.partialorder %v610_v11, 0.0004427343 }
  0xdb   : > { %999 = vlog2.f32 %v613_v51  ;;  %v617_v12 = vadd.f32 1.0, %v616_v58  ;;  %vm620_vm3 = vcmp.lt.f32.partialorder %v619_v18, 0.0004427343 }
  0xdc   : > { %v609_v49 = vmul.f32 %v990_v44, %v608_v8 }
  0xdd   : > { %v618_v25 = vmul.f32 %v992_v45, %v617_v12 }
  0xdf   : > { %v994_v13 = vpop.eup %993 }
  0xe0   : > { %v996_v19 = vpop.eup %995  ;;  %v559_v21 = vmul.f32 0.6931472, %v994_v13 }
  0xe1   : > { %v568_v22 = vmul.f32 0.6931472, %v996_v19 }
  0xe2   : > { %v565_v24 = vsel %vm1666_vm15, %v562_v9, %v559_v21 }
  0xe3   : > { %v574_v27 = vsel %vm573_vm1, %v571_v17, %v568_v22  ;;  %v575_v55 = vadd.f32 %v565_v24, %v547_v15 }
  0xe4   : > { %v998_v50 = vpop.eup %997  ;;  %v576_v0 = vadd.f32 %v574_v27, %v548_v20 }
  0xe5   : > { %v1000_v26 = vpop.eup %999  ;;  %v606_v60 = vmul.f32 0.6931472, %v998_v50 }
  0xe6   : > { %v615_v1 = vmul.f32 0.6931472, %v1000_v26  ;;  %v577_v28 = vsel %vm340_vm0, %v576_v0, 0.0 }
  0xe7   : > { %v612_v14 = vsel %vm611_vm2, %v609_v49, %v606_v60  ;;  %v578_v31 = vadd.f32 %v577_v28, %v575_v55 }
  0xe8   : > { %v621_v29 = vsel %vm620_vm3, %v618_v25, %v615_v1  ;;  %v622_v30 = vadd.f32 %v612_v14, %v594_v23 }
  0xe9   : > { %v623_v32 = vadd.f32 %v621_v29, %v595_v56  ;;  %579 = vadd.xlane.f32.xlu0 %v578_v31 }
  0xeb   : > { %v624_v33 = vsel %vm340_vm0, %v623_v32, 0.0 }
  0xec   : > { %v625_v34 = vadd.f32 %v624_v33, %v622_v30 }
  0xee   : > { %626 = vadd.xlane.f32.xlu0 %v625_v34 }
 0x176   : > { %v580_v35 = vpop.xlane.xlu0 %579 }
 0x177   : > { %v581_v36 = vrot.slane %v580_v35, 4 }
 0x179   : > { %v582_v37 = vadd.f32 %v581_v36, %v580_v35 }
 0x17b   : > { %v627_v38 = vpop.xlane.xlu0 %626  ;;  %v583_v39 = vrot.slane %v582_v37, 2 }
 0x17c   : > { %v628_v40 = vrot.slane %v627_v38, 4 }
 0x17d   : > { %v584_v42 = vadd.f32 %v583_v39, %v582_v37 }
 0x17e   : > { %v629_v41 = vadd.f32 %v628_v40, %v627_v38 }
 0x17f   : > { %v585_v44 = vrot.slane %v584_v42, 1 }
 0x180   : > { %v630_v43 = vrot.slane %v629_v41, 2 }
 0x181   : > { %v586_v46 = vadd.f32 %v585_v44, %v584_v42 }
 0x182   : > { %v631_v45 = vadd.f32 %v630_v43, %v629_v41 }
 0x183   : > { %861 = vpush %v586_v46 }
 0x184   : > { %v632_v47 = vrot.slane %v631_v45, 1 }
 0x186   : > { %v633_v48 = vadd.f32 %v632_v47, %v631_v45 }
 0x188   : > { %863 = vpush %v633_v48 }
 0x1b4   : > { %s862_s21 = spop %861 }
 0x1b5   : > { %v588_v51 = vstv %s862_s21 }
 0x1b6   : > { %589 = vst [vmem:[%s1630_s8] sm:$0xff] %v588_v51 }
 0x1b9   : > { %s864_s6 = spop %863 }
 0x1ba   : > { %v635_v52 = vstv %s864_s6 }
 0x1bb   : > { %636 = vst [vmem:[%s1634_s14] sm:$0xff] %v635_v52 }
 0x1bc PF: > { %s854_s9 = sshll.u32 %s1241_s22, 7  ;;  %s1812_s13 = sld [smem:[#allocation25_spill]] }
 0x1bd   : > { %s656_s10 = sshll.u32 %s1630_s8, 4  ;;  %s638_s12 = scalar_lea.sflag [#allocation5], %s1563_s29  ;;  %s657_s10 = int_to_ptr.vmem [resolvable:$true] %s656_s10 }
 0x1be   : > { %s1091_s5 = scalar_lea.vmem %s657_s10, 128  ;;  %p1813_p3 = scmp.ne.s32.totalorder %s1797_s15, 0 }
 0x1bf   : > { %p1092_p13 = scmp.ne.s32.totalorder %s657_s10, %s1091_s5  ;;  %s1261_s1 = smov [#allocation9]  }
 0x1c0   : > { %s1095_s18 = sshll.u32 %s1261_s1, 4  ;;  %s1096_s18 = int_to_ptr.vmem [resolvable:$false] %s1095_s18 }
 0x1c1   : > { %p1093_p11 = pnand %p1092_p13, %p1813_p3  ;;  %s1097_s30 = scalar_lea.vmem %s1096_s18, 256 }
 0x1c2   : > { %s1682_s3 = scalar_lea.hbm %s1812_s13, %s854_s9  ;;  %p1098_p6 = scmp.lt.s32.totalorder %s657_s10, %s1096_s18 }
 0x1c3   : > { %p1094_p12 = pneg %p1093_p11  ;;  %p1099_p0 = scmp.lt.s32.totalorder %s1097_s30, %s1091_s5 }
 0x1c5   : > { %p1100_p5 = por %p1099_p0, %p1098_p6 }
 0x1c7   : > { %p1101_p2 = pnand %p1100_p5, %p1094_p12 }
 0x1c9   : > { %1104 = shalt.err (!%p1101_p2)
}
 0x1ca   : > { %s1105_s4 = scalar_lea.hbm %s1682_s3, 128  ;;  %s1109_s25 = scalar_lea.hbm %s1812_s13, 256 }
 0x1cb   : > { %p1106_p9 = scmp.ne.s32.totalorder %s1682_s3, %s1105_s4  ;;  %p1110_p4 = scmp.lt.u32.totalorder %s1682_s3, %s1812_s13 }
 0x1cc   : > { %p1111_p10 = scmp.lt.u32.totalorder %s1109_s25, %s1105_s4  ;;  %p1113_p13 = scmp.lt.u32.totalorder %s1105_s4, %s1682_s3 }
 0x1cd   : > { %p1107_p8 = pnand %p1106_p9, %p1813_p3 }
 0x1ce   : > { %p1112_p7 = por %p1111_p10, %p1110_p4 }
 0x1cf   : > { %p1108_p1 = pneg %p1107_p8 }
 0x1d0   : > { %p1114_p11 = por %p1113_p13, %p1112_p7 }
 0x1d2   : > { %p1115_p12 = pnand %p1114_p11, %p1108_p1 }
 0x1d4   : > { %1118 = shalt.err (!%p1115_p12)
}
 0x1d5   : > { %871 = dma.vmem_to_hbm [thread:$0]  (%p1813_p3), %s657_s10, 128, %s1682_s3, %s638_s12  }
 0x1d6   : > { %s1814_s11 = sld [smem:[#allocation26_spill]]  ;;  %s669_s5 = sshll.u32 %s1634_s14, 4  ;;  %s670_s5 = int_to_ptr.vmem [resolvable:$true] %s669_s5 }
 0x1d7   : > { %s643_s1 = scalar_lea.sflag [#allocation11], %s1563_s29  ;;  %s1119_s18 = scalar_lea.vmem %s670_s5, 128 }
 0x1d8   : > { %p1120_p6 = scmp.ne.s32.totalorder %s670_s5, %s1119_s18  ;;  %s1262_s30 = smov [#allocation10]  }
 0x1d9   : > { %s1123_s4 = sshll.u32 %s1262_s30, 4  ;;  %s1124_s4 = int_to_ptr.vmem [resolvable:$false] %s1123_s4 }
 0x1da   : > { %p1121_p0 = pnand %p1120_p6, %p1813_p3  ;;  %s1125_s28 = scalar_lea.vmem %s1124_s4, 256 }
 0x1db   : > { %p1126_p2 = scmp.lt.s32.totalorder %s670_s5, %s1124_s4  ;;  %p1127_p9 = scmp.lt.s32.totalorder %s1125_s28, %s1119_s18 }
 0x1dc   : > { %s1708_s7 = scalar_lea.hbm %s1814_s11, %s854_s9  ;;  %p1122_p5 = pneg %p1121_p0 }
 0x1dd   : > { %p1128_p8 = por %p1127_p9, %p1126_p2 }
 0x1df   : > { %p1129_p1 = pnand %p1128_p8, %p1122_p5 }
 0x1e1   : > { %1132 = shalt.err (!%p1129_p1)
}
 0x1e2   : > { %s1133_s22 = scalar_lea.hbm %s1708_s7, 128  ;;  %s1137_s9 = scalar_lea.hbm %s1814_s11, 256 }
 0x1e3   : > { %p1134_p4 = scmp.ne.s32.totalorder %s1708_s7, %s1133_s22  ;;  %p1138_p13 = scmp.lt.u32.totalorder %s1708_s7, %s1814_s11 }
 0x1e4   : > { %p1139_p11 = scmp.lt.u32.totalorder %s1137_s9, %s1133_s22  ;;  %p1141_p6 = scmp.lt.u32.totalorder %s1133_s22, %s1708_s7 }
 0x1e5   : > { %p1135_p10 = pnand %p1134_p4, %p1813_p3 }
 0x1e6   : > { %p1140_p12 = por %p1139_p11, %p1138_p13 }
 0x1e7   : > { %p1136_p7 = pneg %p1135_p10 }
 0x1e8   : > { %p1142_p0 = por %p1141_p6, %p1140_p12 }
 0x1ea   : > { %p1143_p5 = pnand %p1142_p0, %p1136_p7 }
 0x1ec   : > { %1146 = shalt.err (!%p1143_p5)
}
 0x1ed   : > { %872 = dma.vmem_to_hbm [thread:$0]  (%p1813_p3), %s670_s5, 128, %s1708_s7, %s643_s1  }
 0x1ee PF: > { %s1815_s12 = sld [smem:[#allocation18_spill]]  ;;  %s1816_s27 = sld [smem:[#allocation17_spill]] }
 0x1ef   : > { %s1817_s25 = sld [smem:[#allocation23_spill]] }
 0x1f4   : > { %p893_p2 = scmp.ge.s32.totalorder %s1815_s12, 2  ;;  %s681_s26 = sand.u32 1, %s1816_s27  }
 0x1f5   : > { %p1818_p9 = scmp.ne.s32.totalorder %s1817_s25, 0  ;;  %s682_s8 = scalar_lea.sflag [#allocation5], %s681_s26 }
 0x1f7   : > { %p886_p8 = pnand %p893_p2, %p1818_p9 }
 0x1f9   : > { %1204 = dma.done.wait (!%p886_p8), %s682_s8, 128  }
 0x1fa   : > { %1206 = vsyncadd (!%p886_p8), %s682_s8, 4294967168  ;;  %s691_s21 = scalar_lea.sflag [#allocation11], %s681_s26 }
 0x1fb   : > { %1208 = dma.done.wait (!%p886_p8), %s691_s21, 128  }
 0x1fc   : > { %1210 = vsyncadd (!%p886_p8), %s691_s21, 4294967168  ;;  %s27_s25 = sadd.s32 1, %s1815_s12   ;;  %s1819_s6 = sld [smem:[#allocation22_spill]] }
 0x1fd   : > { %p24_p1 = scmp.ge.s32.totalorder %s27_s25, 8   ;;  %s1820_s7 = sld [smem:[#allocation21_spill]] }
 0x1fe   : > { %s1821_s5 = sld [smem:[#allocation19_spill]]  ;;  %s1822_s1 = sld [smem:[#allocation20_spill]] }
 0x1ff   : > { %s1823_s15 = smov %s1217_s16  ;;  %s1824_s16 = smov %s1221_s17 }
 0x200   : > { %s1826_s18 = smov %s1229_s19  ;;  %s1827_s19 = smov %s1233_s20 }
 0x201   : > { %s1829_s21 = smov %s1245_s23  ;;  %s1830_s22 = smov %s1249_s24 }
 0x202   : > { %s1825_s17 = smov %s1819_s6  ;;  %26 = sbr.rel (!%p24_p1) target bundleno = 17 (0x11), region = 130 }
 0x203   : > { %s1828_s20 = smov %s1820_s7 }
 0x204   : > { %s1831_s23 = smov %s1821_s5  ;;  %s1832_s24 = smov %s1822_s1 }
 0x209   :  { %696 = vsyncpa [#allocation4], 1 }
 0x20a   :  { %698 = vsyncpa [#allocation4 + $0x1], 1 }
 0x20b   :  { %699 = vsyncpa [#allocation7], 1 }
 0x20c   :  { %701 = vsyncpa [#allocation7 + $0x1], 1 }
 0x20d   :  { %702 = vsyncpa [#allocation5], 1 }
 0x20e   :  { %704 = vsyncpa [#allocation5 + $0x1], 1 }
 0x20f   :  { %705 = vsyncpa [#allocation11], 1 }
 0x210   :  { %707 = vsyncpa [#allocation11 + $0x1], 1 }

</bundles_post_ra>
